<compile_context>
chip_gen: v6e
topology: v6e:2x2x1
jax: 0.10.0
libtpu: 0.0.40
codegen_flags: <defaults>
</compile_context>

<pallas_src>
import jax
import jax.numpy as jnp
import numpy as np
from jax.experimental import pallas as pl
from jax.experimental.pallas import tpu as pltpu


def _round_up(x, m):
    return ((x + m - 1) // m) * m


def _physical_vmem_bytes():
    # Generation-aware VMEM: v5e/v6e = 128 MiB, v7x = 64 MiB per TensorCore.
    # Fall back to the conservative v7x figure if the query is unavailable.
    try:
        info = pltpu.get_tpu_info()
        cap = getattr(info, "vmem_capacity_bytes", None)
        if cap:
            return int(cap)
    except Exception:
        pass
    return 64 * 1024 * 1024


def _dnf_kernel(x_ref, wc_ref, wd_ref, bc_ref, bd_ref, out_ref):
    # x: [TB, P] (input dtype)  wc: [P, Cp]  wd: [Cp, Op]  bc: [1, Cp]  bd: [1, Op]
    # MXU operands in the weights' dtype (bf16 by default), f32 accumulation.
    x = x_ref[...].astype(wc_ref.dtype)
    conj = jnp.dot(x, wc_ref[...], preferred_element_type=jnp.float32)
    h = jnp.tanh(conj + bc_ref[...])                      # f32 tail (v5e-safe)
    disj = jnp.dot(h.astype(wd_ref.dtype), wd_ref[...],
                   preferred_element_type=jnp.float32)
    out_ref[...] = jax.nn.sigmoid(disj + bd_ref[...]).astype(out_ref.dtype)


def make_dnf_classifier(num_preds, num_conjuncts, n_out, delta=0.01,
                        batch_tile=1024, compute_dtype=jnp.bfloat16):
    """Returns (apply_fn, params). Deterministic 'normal' weight init (std=0.1)."""
    key = jax.random.PRNGKey(0)
    k_c, k_d = jax.random.split(key)
    # PyTorch stores weights as [out, in]; we keep the transposed [in, out] copy.
    wc_t = (0.1 * jax.random.normal(k_c, (num_preds, num_conjuncts))).astype(jnp.float32)
    wd_t = (0.1 * jax.random.normal(k_d, (num_conjuncts, n_out))).astype(jnp.float32)

    # ---- weight-only bias terms, computed once in f32, pre-scaled by delta ----
    abs_wc = jnp.abs(wc_t)
    bias_c = delta * (jnp.max(abs_wc, axis=0) - jnp.sum(abs_wc, axis=0))   # [C]
    abs_wd = jnp.abs(wd_t)
    bias_d = delta * (jnp.sum(abs_wd, axis=0) - jnp.max(abs_wd, axis=0))   # [O]

    # ---- pad only C/O (weight output dims) to lane-friendly multiples of 128.
    # (On v6e/v7x the MXU is 256 wide; multiples of 256 would be marginally
    #  better for large C/O — kept at 128 here since these dims are small.)
    Cp = _round_up(num_conjuncts, 128)
    Op = _round_up(n_out, 128)

    wc_pad = jnp.zeros((num_preds, Cp), compute_dtype).at[
        :, :num_conjuncts].set(wc_t.astype(compute_dtype))
    wd_pad = jnp.zeros((Cp, Op), compute_dtype).at[
        :num_conjuncts, :n_out].set(wd_t.astype(compute_dtype))
    bc_pad = jnp.zeros((1, Cp), jnp.float32).at[0, :num_conjuncts].set(bias_c)
    bd_pad = jnp.zeros((1, Op), jnp.float32).at[0, :n_out].set(bias_d)

    vmem = pltpu.MemorySpace.VMEM
    w_bytes = jnp.dtype(compute_dtype).itemsize

    def apply(x):
        assert x.ndim == 2 and x.shape[1] == num_preds
        B = x.shape[0]
        in_bytes = jnp.dtype(x.dtype).itemsize

        # ---- batch tiling: cdiv grid, ragged last block, no wrapper padding ----
        B8 = _round_up(B, 8)                # sublane-friendly tile size only
        TB = min(batch_tile, B8)
        # v7x megacore: ensure >= 2 grid steps (when splittable) so the second
        # TensorCore gets work.  No-op on v5e/v6e and for tiny batches.
        if pl.cdiv(B, TB) < 2 and B8 >= 16:
            TB = _round_up((B8 + 1) // 2, 8)

        # ---- generation-aware VMEM budget (counts default double-buffering of
        #      EVERY spec, including the invariant weight/bias specs) ----
        vmem_cap = int(_physical_vmem_bytes() * 0.85)   # headroom for scratch
        weight_bytes = (2 * (num_preds * Cp + Cp * Op) * w_bytes
                        + 2 * (Cp + Op) * 4)

        def _tile_bytes(tb):
            return 2 * tb * num_preds * in_bytes + 2 * tb * Op * 4

        while weight_bytes + _tile_bytes(TB) > vmem_cap and TB > 8:
            TB = max(8, _round_up(TB // 2, 8))
        if weight_bytes + _tile_bytes(TB) > vmem_cap:
            # TODO(synk): fall back to a (batch, C-tile) grid with an f32
            # accumulator scratch instead of fully-resident weights.
            raise ValueError(
                "DNF weights do not fit in VMEM with fully-resident layout; "
                "need a C-tiled fallback for this size.")

        grid = (pl.cdiv(B, TB),)
        vmem_limit = int(min(vmem_cap,
                             max(weight_bytes + _tile_bytes(TB) + (4 << 20),
                                 32 * 1024 * 1024)))

        cost = pl.CostEstimate(
            flops=2 * B * (num_preds * Cp + Cp * Op),
            transcendentals=B * (Cp + Op),
            bytes_accessed=(B * num_preds * in_bytes + B * Op * 4
                            + (num_preds * Cp + Cp * Op) * w_bytes
                            + (Cp + Op) * 4),
        )

        out_pad = pl.pallas_call(
            _dnf_kernel,
            out_shape=jax.ShapeDtypeStruct((B, Op), jnp.float32),
            grid=grid,
            in_specs=[
                # x tile: streamed, full (unpadded) predicate dim
                pl.BlockSpec((TB, num_preds), lambda i: (i, 0), memory_space=vmem),
                # resident weights / biases (constant index_map -> no re-DMA)
                pl.BlockSpec((num_preds, Cp), lambda i: (0, 0), memory_space=vmem),
                pl.BlockSpec((Cp, Op), lambda i: (0, 0), memory_space=vmem),
                pl.BlockSpec((1, Cp), lambda i: (0, 0), memory_space=vmem),
                pl.BlockSpec((1, Op), lambda i: (0, 0), memory_space=vmem),
            ],
            out_specs=pl.BlockSpec((TB, Op), lambda i: (i, 0), memory_space=vmem),
            compiler_params=pltpu.CompilerParams(
                dimension_semantics=("parallel",),
                vmem_limit_bytes=vmem_limit,
            ),
            cost_estimate=cost,
        )(x, wc_pad, wd_pad, bc_pad, bd_pad)

        # strip the output lane padding (batch is never padded)
        return out_pad[:, :n_out]

    return apply, (wc_t, wd_t)


def _reference(x, wc_t, wd_t, delta):
    abs_wc = jnp.abs(wc_t)
    bias_c = jnp.max(abs_wc, axis=0) - jnp.sum(abs_wc, axis=0)
    h = jnp.tanh(x @ wc_t + delta * bias_c[None, :])
    abs_wd = jnp.abs(wd_t)
    bias_d = jnp.sum(abs_wd, axis=0) - jnp.max(abs_wd, axis=0)
    return jax.nn.sigmoid(h @ wd_t + delta * bias_d[None, :])


if __name__ == "__main__":
    B, NUM_PREDS, NUM_CONJUNCTS, N_OUT = 8, 32, 16, 8
    DELTA = 0.01

    x = jax.random.normal(jax.random.PRNGKey(0), (B, NUM_PREDS), dtype=jnp.float32)

    # f32 MXU-operand path: matches the f32 reference tightly.
    apply_f32, (wc_t, wd_t) = make_dnf_classifier(
        NUM_PREDS, NUM_CONJUNCTS, N_OUT, DELTA, compute_dtype=jnp.float32)
    out_f32 = jax.block_until_ready(apply_f32(x))

    # bf16 MXU-operand path (f32 accumulation): the recommended v6e/v7x config.
    apply_bf16, _ = make_dnf_classifier(
        NUM_PREDS, NUM_CONJUNCTS, N_OUT, DELTA, compute_dtype=jnp.bfloat16)
    out_bf16 = jax.block_until_ready(apply_bf16(x))

    ref = _reference(x, wc_t, wd_t, DELTA)
    assert out_f32.shape == (B, N_OUT)
    assert out_bf16.shape == (B, N_OUT)
    assert np.allclose(np.asarray(out_f32), np.asarray(ref), atol=1e-5, rtol=1e-5)
    # bf16 operands loosen the tolerance vs. the f32 reference (expected).
    assert np.allclose(np.asarray(out_bf16), np.asarray(ref), atol=2e-2, rtol=2e-2)

    print("KERNEL_OK")
</pallas_src>

<mosaic_0001>
module attributes {stable_mosaic.version = 11 : i64} {
  func.func @_dnf_kernel(%arg0: i32, %arg1: memref<8x32xf32, #tpu.memory_space<vmem>>, %arg2: memref<32x128xf32, #tpu.memory_space<vmem>>, %arg3: memref<128x128xf32, #tpu.memory_space<vmem>>, %arg4: memref<1x128xf32, #tpu.memory_space<vmem>>, %arg5: memref<1x128xf32, #tpu.memory_space<vmem>>, %arg6: memref<8x128xf32, #tpu.memory_space<vmem>>) attributes {dimension_semantics = [#tpu.dimension_semantics<parallel>], iteration_bounds = array<i64: 1>, scalar_prefetch = 0 : i64, scratch_operands = 0 : i64, tpu.core_type = #tpu.core_type<tc>, window_params = [{transform_indices = @transform_0, window_bounds = array<i64: 8, 32>}, {pipeline_mode = #tpu.pipeline_mode<synchronous>, transform_indices = @transform_1, window_bounds = array<i64: 32, 128>}, {pipeline_mode = #tpu.pipeline_mode<synchronous>, transform_indices = @transform_2, window_bounds = array<i64: 128, 128>}, {pipeline_mode = #tpu.pipeline_mode<synchronous>, transform_indices = @transform_3, window_bounds = array<i64: 1, 128>}, {pipeline_mode = #tpu.pipeline_mode<synchronous>, transform_indices = @transform_4, window_bounds = array<i64: 1, 128>}, {transform_indices = @transform_5, window_bounds = array<i64: 8, 128>}]} {
    %c0 = arith.constant 0 : index
    %c0_0 = arith.constant 0 : index
    %0 = vector.load %arg1[%c0, %c0_0] : memref<8x32xf32, #tpu.memory_space<vmem>>, vector<8x32xf32>
    %c0_1 = arith.constant 0 : index
    %c0_2 = arith.constant 0 : index
    %1 = vector.load %arg2[%c0_1, %c0_2] : memref<32x128xf32, #tpu.memory_space<vmem>>, vector<32x128xf32>
    %cst = arith.constant dense<0.000000e+00> : vector<8x128xf32>
    %2 = tpu.matmul %0, %1, %cst {dimension_numbers = #tpu.dot_dimension_numbers<[1], [0], [0], [1], [0, 0, 1, 1], [], []>} : vector<8x32xf32>, vector<32x128xf32>, vector<8x128xf32> -> vector<8x128xf32>
    %c0_3 = arith.constant 0 : index
    %c0_4 = arith.constant 0 : index
    %3 = vector.load %arg4[%c0_3, %c0_4] : memref<1x128xf32, #tpu.memory_space<vmem>>, vector<1x128xf32>
    %4 = vector.broadcast %3 : vector<1x128xf32> to vector<8x128xf32>
    %5 = arith.addf %2, %4 : vector<8x128xf32>
    %6 = math.tanh %5 : vector<8x128xf32>
    %c0_5 = arith.constant 0 : index
    %c0_6 = arith.constant 0 : index
    %7 = vector.load %arg3[%c0_5, %c0_6] : memref<128x128xf32, #tpu.memory_space<vmem>>, vector<128x128xf32>
    %cst_7 = arith.constant dense<0.000000e+00> : vector<8x128xf32>
    %8 = tpu.matmul %6, %7, %cst_7 {dimension_numbers = #tpu.dot_dimension_numbers<[1], [0], [0], [1], [0, 0, 1, 1], [], []>} : vector<8x128xf32>, vector<128x128xf32>, vector<8x128xf32> -> vector<8x128xf32>
    %c0_8 = arith.constant 0 : index
    %c0_9 = arith.constant 0 : index
    %9 = vector.load %arg5[%c0_8, %c0_9] : memref<1x128xf32, #tpu.memory_space<vmem>>, vector<1x128xf32>
    %10 = vector.broadcast %9 : vector<1x128xf32> to vector<8x128xf32>
    %11 = arith.addf %8, %10 : vector<8x128xf32>
    %12 = arith.negf %11 : vector<8x128xf32>
    %13 = math.exp %12 : vector<8x128xf32>
    %cst_10 = arith.constant 1.000000e+00 : f32
    %14 = vector.broadcast %cst_10 : f32 to vector<8x128xf32>
    %15 = arith.addf %14, %13 : vector<8x128xf32>
    %16 = arith.divf %14, %15 : vector<8x128xf32>
    %c0_11 = arith.constant 0 : index
    %c0_12 = arith.constant 0 : index
    %17 = vector.load %arg6[%c0_11, %c0_12] : memref<8x128xf32, #tpu.memory_space<vmem>>, vector<8x128xf32>
    tpu.vector_store %arg6[%c0_11, %c0_12], %16 {strides = array<i32>} : memref<8x128xf32, #tpu.memory_space<vmem>>, vector<8x128xf32>,
    return
  }
  func.func @transform_0(%arg0: i32) -> (i32, i32) {
    %c0_i32 = arith.constant 0 : i32
    %c0_i32_0 = arith.constant 0 : i32
    return %arg0, %c0_i32 : i32, i32
  }
  func.func @transform_1(%arg0: i32) -> (i32, i32) {
    %c0_i32 = arith.constant 0 : i32
    %c0_i32_0 = arith.constant 0 : i32
    %c0_i32_1 = arith.constant 0 : i32
    return %c0_i32, %c0_i32_0 : i32, i32
  }
  func.func @transform_2(%arg0: i32) -> (i32, i32) {
    %c0_i32 = arith.constant 0 : i32
    %c0_i32_0 = arith.constant 0 : i32
    %c0_i32_1 = arith.constant 0 : i32
    return %c0_i32, %c0_i32_0 : i32, i32
  }
  func.func @transform_3(%arg0: i32) -> (i32, i32) {
    %c0_i32 = arith.constant 0 : i32
    %c0_i32_0 = arith.constant 0 : i32
    %c0_i32_1 = arith.constant 0 : i32
    return %c0_i32, %c0_i32_0 : i32, i32
  }
  func.func @transform_4(%arg0: i32) -> (i32, i32) {
    %c0_i32 = arith.constant 0 : i32
    %c0_i32_0 = arith.constant 0 : i32
    %c0_i32_1 = arith.constant 0 : i32
    return %c0_i32, %c0_i32_0 : i32, i32
  }
  func.func @transform_5(%arg0: i32) -> (i32, i32) {
    %c0_i32 = arith.constant 0 : i32
    %c0_i32_0 = arith.constant 0 : i32
    return %arg0, %c0_i32 : i32, i32
  }
}

</mosaic_0001>

<bundles_post_ra>
// kernel: tpu_custom_call.1
= control target key start
LH: loop header
LB: loop body
LE: loop exit
PB: predicated region body
PF: predicated region fallthrough
CT: control target
= control target key end

     0   :  { %10 = vsyncpa [#allocation3], 0  ;;  %s513_s0 = inlined_call_operand.hbm [shape: f32[8,32], index: 0, kind: input, shape index: {}]   ;;  %s514_s1 = inlined_call_operand.hbm [shape: f32[32,128], index: 1, kind: input, shape index: {}]   ;;  %s515_s2 = inlined_call_operand.hbm [shape: f32[128,128], index: 2, kind: input, shape index: {}]   ;;  %s516_s3 = inlined_call_operand.vmem [shape: f32[1,128], index: 3, kind: input, shape index: {}]   ;;  %s517_s4 = inlined_call_operand.vmem [shape: f32[1,128], index: 4, kind: input, shape index: {}]   ;;  %s518_s5 = inlined_call_operand.hbm [shape: f32[8,128], index: 5, kind: output, shape index: {}]  }
   0x1   :  { %11 = vsyncpa [#allocation6], 0 }
   0x2   :  { %12 = vsyncpa [#allocation4], 0  ;;  %s435_s18 = smov [#allocation5]  }
   0x3   :  { %s28_s19 = sshll.u32 %s435_s18, 4  ;;  %s29_s19 = int_to_ptr.vmem [resolvable:$true] %s28_s19 }
   0x4   :  { %s357_s20 = scalar_lea.vmem %s29_s19, 512  ;;  %p362_p1 = scmp.lt.s32.totalorder %s29_s19, %s29_s19 }
   0x5   :  { %p358_p0 = scmp.ne.s32.totalorder %s29_s19, %s357_s20  ;;  %p363_p2 = scmp.lt.s32.totalorder %s357_s20, %s357_s20 }
   0x7   :  { %p364_p3 = por %p363_p2, %p362_p1 }
   0x9   :  { %p365_p4 = pnand %p364_p3, %p358_p0 }
   0xb   :  { %368 = shalt.err (!%p365_p4)
}
   0xc   :  { %s436_s21 = smov 128   ;;  %s437_s22 = smov 8  }
   0xd   :  { %34 = dma.hbm_to_vmem [thread:$0]  %s514_s1, 512, %s29_s19, [#allocation6], %s436_s21, %s436_s21, %s437_s22  }
   0xe   :  { %s438_s25 = smov [#allocation2]   ;;  %s439_s27 = smov [#allocation7]  }
   0xf   :  { %s19_s26 = sshll.u32 %s438_s25, 4  ;;  %s40_s28 = sshll.u32 %s439_s27, 4  ;;  %s20_s26 = int_to_ptr.vmem [resolvable:$true] %s19_s26  ;;  %s41_s28 = int_to_ptr.vmem [resolvable:$true] %s40_s28 }
  0x10   :  { %s377_s29 = scalar_lea.vmem %s20_s26, 128  ;;  %p382_p6 = scmp.lt.s32.totalorder %s20_s26, %s20_s26 }
  0x11   :  { %p378_p5 = scmp.ne.s32.totalorder %s20_s26, %s377_s29  ;;  %p383_p7 = scmp.lt.s32.totalorder %s377_s29, %s377_s29 }
  0x13   :  { %p384_p8 = por %p383_p7, %p382_p6 }
  0x15   :  { %p385_p9 = pnand %p384_p8, %p378_p5 }
  0x17   :  { %388 = shalt.err (!%p385_p9)
}
  0x18   :  { %22 = dma.hbm_to_vmem [thread:$0]  %s513_s0, 128, %s20_s26, [#allocation3]  }
  0x19   :  { %s397_s7 = scalar_lea.vmem %s41_s28, 2048  ;;  %p402_p11 = scmp.lt.s32.totalorder %s41_s28, %s41_s28 }
  0x1a   :  { %p398_p10 = scmp.ne.s32.totalorder %s41_s28, %s397_s7  ;;  %p403_p12 = scmp.lt.s32.totalorder %s397_s7, %s397_s7 }
  0x1c   :  { %p404_p13 = por %p403_p12, %p402_p11 }
  0x1e   :  { %p405_p0 = pnand %p404_p13, %p398_p10 }
  0x20   :  { %408 = shalt.err (!%p405_p0)
}
  0x21   :  { %46 = dma.hbm_to_vmem [thread:$0]  %s515_s2, 2048, %s41_s28, [#allocation6], %s436_s21, %s436_s21, %s437_s22  }
  0x22   :  { %429 = dma.done.wait [#allocation3], 128  }
  0x23   :  { %430 = vsyncadd [#allocation3], 4294967168 }
  0x24   :  { %431 = dma.done.wait [#allocation6], 2560  }
  0x25   :  { %432 = vsyncadd [#allocation6], 4294964736  ;;  %v440_v0 = vmov 0.0   ;;  %vm441_vm0 = vmmov 0   ;;  %v64_v1 = vld [vmem:[#allocation5 + $0x18] sm:$0xff]  ;;  %v63_v2 = vld [vmem:[#allocation5 + $0x10] sm:$0xff] }
  0x26   :  { %289 = vmatprep.subr.mxu0 %v440_v0  ;;  %297 = vmatprep.mubr.msk.f32.mxu0 %vm441_vm0, %v440_v0  ;;  %v162_v3 = vld [vmem:[#allocation7 + $0x78] sm:$0xff]  ;;  %v62_v4 = vld [vmem:[#allocation5 + $0x8] sm:$0xff]  ;;  %v161_v5 = vld [vmem:[#allocation7 + $0x70] sm:$0xff]  ;;  %vm72_vm1 = vcmask 261120   ;;  %s442_s11 = smov [#allocation8]  }
  0x27   :  { %300 = vmatprep.subr.mxu1 %v440_v0  ;;  %332 = vmatprep.mubr.msk.f32.mxu1 %vm441_vm0, %v440_v0  ;;  %v160_v6 = vld [vmem:[#allocation7 + $0x68] sm:$0xff]  ;;  %v61_v7 = vld [vmem:[#allocation5] sm:$0xff]  ;;  %v60_v8 = vld [vmem:[#allocation2] sm:$0xff] }
  0x28   :  { %290 = vmatpush3.msra.mxu0 %v64_v1  ;;  %301 = vmatpush3.msra.mxu1 %v162_v3  ;;  %v159_v9 = vld [vmem:[#allocation7 + $0x60] sm:$0xff]  ;;  %v158_v10 = vld [vmem:[#allocation7 + $0x58] sm:$0xff]  ;;  %v157_v11 = vld [vmem:[#allocation7 + $0x50] sm:$0xff] }
  0x29   :  { %291 = vmatprep.subr.mxu0 %v440_v0  ;;  %302 = vmatprep.subr.mxu1 %v440_v0  ;;  %v156_v12 = vld [vmem:[#allocation7 + $0x48] sm:$0xff]  ;;  %v155_v13 = vld [vmem:[#allocation7 + $0x40] sm:$0xff]  ;;  %v154_v14 = vld [vmem:[#allocation7 + $0x38] sm:$0xff] }
  0x2a   :  { %292 = vmatpush3.msra.mxu0 %v63_v2  ;;  %303 = vmatpush3.msra.mxu1 %v161_v5  ;;  %v153_v15 = vld [vmem:[#allocation7 + $0x30] sm:$0xff]  ;;  %v152_v16 = vld [vmem:[#allocation7 + $0x28] sm:$0xff]  ;;  %v151_v17 = vld [vmem:[#allocation7 + $0x20] sm:$0xff] }
  0x2b   :  { %293 = vmatprep.subr.mxu0 %v440_v0  ;;  %304 = vmatprep.subr.mxu1 %v440_v0  ;;  %v150_v18 = vld [vmem:[#allocation7 + $0x18] sm:$0xff]  ;;  %v149_v19 = vld [vmem:[#allocation7 + $0x10] sm:$0xff]  ;;  %v148_v20 = vld [vmem:[#allocation7 + $0x8] sm:$0xff] }
  0x2c   :  { %294 = vmatpush3.msra.mxu0 %v62_v4  ;;  %305 = vmatpush3.msra.mxu1 %v160_v6  ;;  %v147_v21 = vld [vmem:[#allocation7] sm:$0xff]  ;;  %v263_v22 = vld [vmem:[%s516_s3] ss:$0 sm:$0xff]  ;;  %s253_s3 = sshll.u32 %s442_s11, 4  ;;  %s254_s3 = int_to_ptr.vmem [resolvable:$true] %s253_s3 }
  0x2d   :  { %295 = vmatprep.subr.mxu0 %v440_v0  ;;  %306 = vmatprep.subr.mxu1 %v440_v0  ;;  %v265_v27 = vld [vmem:[%s517_s4] ss:$0 sm:$0xff]  ;;  %s409_s12 = scalar_lea.vmem %s254_s3, 128  ;;  %p414_p2 = scmp.lt.s32.totalorder %s254_s3, %s254_s3 }
  0x2e   :  { %296 = vmatpush3.msra.mxu0 %v61_v7  ;;  %307 = vmatpush3.msra.mxu1 %v159_v9  ;;  %p410_p1 = scmp.ne.s32.totalorder %s254_s3, %s409_s12  ;;  %p415_p3 = scmp.lt.s32.totalorder %s409_s12, %s409_s12 }
  0x2f   :  { %298 = vmatmul.mubr.msk.f32.vlgmr.msra.gmra.mxu0 %vm72_vm1, %v60_v8  ;;  %308 = vmatprep.subr.mxu1 %v440_v0 }
  0x30   :  { %309 = vmatpush3.msra.mxu1 %v158_v10  ;;  %p416_p4 = por %p415_p3, %p414_p2 }
  0x31   :  { %310 = vmatprep.subr.mxu1 %v440_v0 }
  0x32   :  { %311 = vmatpush3.msra.mxu1 %v157_v11  ;;  %p417_p5 = pnand %p416_p4, %p410_p1 }
  0x33   :  { %312 = vmatprep.subr.mxu1 %v440_v0 }
  0x34   :  { %313 = vmatpush3.msra.mxu1 %v156_v12 }
  0x35   :  { %314 = vmatprep.subr.mxu1 %v440_v0 }
  0x36   :  { %315 = vmatpush3.msra.mxu1 %v155_v13 }
  0x37   :  { %316 = vmatprep.subr.mxu1 %v440_v0 }
  0x38   :  { %317 = vmatpush3.msra.mxu1 %v154_v14 }
  0x39   :  { %318 = vmatprep.subr.mxu1 %v440_v0 }
  0x3a   :  { %319 = vmatpush3.msra.mxu1 %v153_v15 }
  0x3b   :  { %320 = vmatprep.subr.mxu1 %v440_v0 }
  0x3c   :  { %321 = vmatpush3.msra.mxu1 %v152_v16 }
  0x3d   :  { %322 = vmatprep.subr.mxu1 %v440_v0 }
  0x3e   :  { %323 = vmatpush3.msra.mxu1 %v151_v17 }
  0x3f   :  { %324 = vmatprep.subr.mxu1 %v440_v0 }
  0x40   :  { %325 = vmatpush3.msra.mxu1 %v150_v18 }
  0x41   :  { %326 = vmatprep.subr.mxu1 %v440_v0 }
  0x42   :  { %327 = vmatpush3.msra.mxu1 %v149_v19 }
  0x43   :  { %328 = vmatprep.subr.mxu1 %v440_v0 }
  0x44   :  { %329 = vmatpush3.msra.mxu1 %v148_v20 }
  0x45   :  { %330 = vmatprep.subr.mxu1 %v440_v0 }
  0x46   :  { %331 = vmatpush3.msra.mxu1 %v147_v21 }
  0xef   :  { %v142_v23 = vpop.f32.mrf.mxu0 }
  0xf0   :  { %v143_v24 = vadd.f32 %v263_v22, %v142_v23 }
  0xf1   :  { %v299_v25 = vpop.f32.mrf.mxu0 }
  0xf2   :  { %343 = vtanh.f32 %v143_v24 }
  0xff   :  { %v344_v26 = vpop.eup %343 }
 0x100   :  { %333 = vmatmul.mubr.f32.vlgmr.msra.gmra.mxu1 %v344_v26 }
 0x1c0   :  { %v236_v28 = vpop.f32.mrf.mxu1 }
 0x1c1   :  { %v237_v29 = vadd.f32 %v265_v27, %v236_v28 }
 0x1c2   :  { %v334_v30 = vpop.f32.mrf.mxu1 }
 0x1c3   :  { %v266_v31 = vmul.f32 -1.442695, %v237_v29 }
 0x1c5   :  { %345 = vpow2.f32 %v266_v31 }
 0x1d2   :  { %v346_v32 = vpop.eup %345 }
 0x1d3   :  { %v243_v33 = vadd.f32 1.0, %v346_v32 }
 0x1d5   :  { %347 = vrcp.f32 %v243_v33 }
 0x1e2   :  { %v348_v34 = vpop.eup %347 }
 0x1e3   :  { %246 = vst [vmem:[#allocation8] sm:$0xff] %v348_v34 }
 0x1e4   :  { %420 = shalt.err (!%p417_p5)
}
 0x1e5   :  { %256 = dma.vmem_to_hbm [thread:$0]  %s254_s3, 128, %s518_s5, [#allocation4]  }
 0x1e6   :  { %433 = dma.done.wait [#allocation4], 128  }
 0x1e7   :  { %434 = vsyncadd [#allocation4], 4294967168 }
 0x1e8   :  { %260 = vsyncpa [#allocation3], 1 }
 0x1e9   :  { %261 = vsyncpa [#allocation6], 1 }
 0x1ea   :  { %262 = vsyncpa [#allocation4], 1 }

</bundles_post_ra>
